<compile_context>
chip_gen: v6e
topology: v6e:2x2x1
jax: 0.10.0
libtpu: 0.0.40
codegen_flags: <defaults>
</compile_context>

<pallas_src>
import functools
import math

import jax
import jax.numpy as jnp
from jax.experimental import pallas as pl
from jax.experimental.pallas import tpu as pltpu


def _round_up(v, m):
    return (v + m - 1) // m * m


def _temporal_kernel(x_ref, w_ref, b_ref, o_ref, slab_ref, *, T):
    """One grid step: Mb = block_b*T rows of the flattened (B*T, Cin) input.

    x_ref   : (Mb, Cin)         input rows (whole batch elements only)
    w_ref   : (3*Cin, Cout_p)   fused conv weights [W0; W1; W2]
    b_ref   : (1, Cout_p)       bias (zero padded), float32
    o_ref   : (Mb, Cout_p)      output rows
    slab_ref: (Mb, 3*Cin)       VMEM scratch, im2col slab
    """
    Mb, Cin = x_ref.shape
    x = x_ref[...]

    # Position within the sequence for every row of this block.  Blocks hold
    # whole batch elements, so row m has t = m % T.
    t = jax.lax.broadcasted_iota(jnp.int32, (Mb, Cin), 0) % T
    zero_row = jnp.zeros((1, Cin), x.dtype)

    # ---- assemble the im2col slab [x[t-1] | x[t] | x[t+1]] in VMEM scratch ----
    # center tap (k=1): x[m]
    slab_ref[:, Cin:2 * Cin] = x
    # left tap (k=0): slab[m, 0:Cin] = x[m-1], zero where t == 0 (conv zero pad
    # and cross-batch boundary).  Achieved by zeroing *source* rows with
    # t == T-1 and storing them shifted down by one row.
    slab_ref[0:1, 0:Cin] = zero_row
    slab_ref[1:Mb, 0:Cin] = jnp.where(t == T - 1, 0.0, x)[0:Mb - 1, :]
    # right tap (k=2): slab[m, 2Cin:3Cin] = x[m+1], zero where t == T-1.
    slab_ref[0:Mb - 1, 2 * Cin:3 * Cin] = jnp.where(t == 0, 0.0, x)[1:Mb, :]
    slab_ref[Mb - 1:Mb, 2 * Cin:3 * Cin] = zero_row

    # ---- one fused MXU matmul (K = 3*Cin), bias folded in, ReLU, dense store ----
    acc = jnp.dot(slab_ref[...], w_ref[...], preferred_element_type=jnp.float32)
    acc = acc + b_ref[...]
    o_ref[...] = jnp.maximum(acc, 0.0).astype(o_ref.dtype)


def temporal_forward(x, w, b, *, block_b=None, compute_dtype=None):
    """x: (B, T, Cin); w: (3, Cin, Cout) with w[k, ci, co] == torch_weight[co, ci, k];
    b: (Cout,). Returns ReLU(Conv1d(k=3, stride=1, padding=1)) as (B, T, Cout)."""
    B, T, Cin = x.shape
    K, Cin_w, Cout = w.shape
    assert K == 3 and Cin_w == Cin

    out_dtype = x.dtype
    if compute_dtype is not None:       # e.g. jnp.bfloat16 on v6e/v7x
        x = x.astype(compute_dtype)
        w = w.astype(compute_dtype)

    # Lane-dense output: pad Cout (weights + bias) to a multiple of 128.
    Cout_p = _round_up(Cout, 128)
    w_f = w.reshape(3 * Cin, Cout)      # fuse the 3 taps along K
    if Cout_p != Cout:
        w_f = jnp.pad(w_f, ((0, 0), (0, Cout_p - Cout)))
        b = jnp.pad(b, (0, Cout_p - Cout))
    b2 = b.reshape(1, Cout_p).astype(jnp.float32)

    # Batch-block size: big enough to amortize per-step overhead, matmul tile
    # capped at ~512 rows, working set well under the VMEM budget (conservative
    # for v7x's 64 MiB physical VMEM).
    if block_b is None:
        bytes_per_b = 4 * T * (7 * Cin + 3 * Cout_p)   # in/out (dbl-buf) + slab + temps
        vmem_budget = 12 * 1024 * 1024
        block_b = max(1, min(B, vmem_budget // max(bytes_per_b, 1),
                             max(1, 512 // T)))
    sub = 8 // math.gcd(T, 8)           # make Mb = block_b*T a multiple of 8
    block_b = _round_up(max(block_b, 1), sub)
    B_pad = _round_up(B, block_b)

    # Fold (B, T) -> M rows (free reshape; no time-padded copy of x in HBM).
    x2 = x.reshape(B * T, Cin)
    if B_pad != B:
        x2 = jnp.pad(x2, ((0, (B_pad - B) * T), (0, 0)))
    M = B_pad * T
    Mb = block_b * T

    kernel = functools.partial(_temporal_kernel, T=T)
    flops = 2 * M * (3 * Cin) * Cout_p
    bytes_accessed = (x2.size * x2.dtype.itemsize
                      + w_f.size * w_f.dtype.itemsize
                      + b2.size * 4
                      + M * Cout_p * jnp.dtype(out_dtype).itemsize)

    out2 = pl.pallas_call(
        kernel,
        out_shape=jax.ShapeDtypeStruct((M, Cout_p), out_dtype),
        grid_spec=pltpu.PrefetchScalarGridSpec(
            num_scalar_prefetch=0,
            grid=(B_pad // block_b,),
            in_specs=[
                pl.BlockSpec((Mb, Cin), lambda i: (i, 0)),
                pl.BlockSpec((3 * Cin, Cout_p), lambda i: (0, 0)),
                pl.BlockSpec((1, Cout_p), lambda i: (0, 0)),
            ],
            out_specs=pl.BlockSpec((Mb, Cout_p), lambda i: (i, 0)),
            scratch_shapes=[pltpu.VMEM((Mb, 3 * Cin), x2.dtype)],
        ),
        compiler_params=pltpu.CompilerParams(
            dimension_semantics=("parallel",),
            vmem_limit_bytes=32 * 1024 * 1024,
        ),
        cost_estimate=pl.CostEstimate(
            flops=flops, transcendentals=0, bytes_accessed=bytes_accessed),
    )(x2, w_f, b2)

    return out2[:B * T, :Cout].reshape(B, T, Cout)


def temporal_reference(x, w, b):
    """Pure-JAX reference of the same conv+ReLU for a correctness check."""
    x_pad = jnp.pad(x, ((0, 0), (1, 1), (0, 0)))
    T = x.shape[1]
    acc = jnp.zeros((x.shape[0], T, w.shape[-1]), jnp.float32)
    for k in range(3):
        acc = acc + jnp.einsum("btc,cd->btd", x_pad[:, k:k + T, :], w[k])
    return jnp.maximum(acc + b[None, None, :], 0.0)


if __name__ == "__main__":
    B, T = 2, 8
    Cin, Cout = 32, 32  # input_size, out_size

    key = jax.random.PRNGKey(0)
    kx, kw, kb = jax.random.split(key, 3)

    x = jax.random.normal(kx, (B, T, Cin), dtype=jnp.float32)
    # Deterministic parameter init (torch Conv1d default scale, uniform in
    # +/- 1/sqrt(Cin*kernel)); w[k, ci, co] corresponds to torch weight[co, ci, k].
    bound = 1.0 / jnp.sqrt(jnp.float32(Cin * 3))
    w = jax.random.uniform(kw, (3, Cin, Cout), jnp.float32, -bound, bound)
    b = jax.random.uniform(kb, (Cout,), jnp.float32, -bound, bound)

    out = temporal_forward(x, w, b)
    jax.block_until_ready(out)

    ref = temporal_reference(x, w, b)
    assert out.shape == (B, T, Cout)
    assert jnp.allclose(out, ref, atol=2e-4, rtol=2e-4)

    print("KERNEL_OK")
</pallas_src>

<mosaic_0001>
module attributes {stable_mosaic.version = 11 : i64} {
  func.func @_temporal_kernel(%arg0: i32, %arg1: memref<16x32xf32, #tpu.memory_space<vmem>>, %arg2: memref<96x128xf32, #tpu.memory_space<vmem>>, %arg3: memref<1x128xf32, #tpu.memory_space<vmem>>, %arg4: memref<16x128xf32, #tpu.memory_space<vmem>>, %arg5: memref<16x96xf32, #tpu.memory_space<vmem>>) attributes {dimension_semantics = [#tpu.dimension_semantics<parallel>], iteration_bounds = array<i64: 1>, scalar_prefetch = 0 : i64, scratch_operands = 1 : i64, tpu.core_type = #tpu.core_type<tc>, window_params = [{transform_indices = @transform_0, window_bounds = array<i64: 16, 32>}, {pipeline_mode = #tpu.pipeline_mode<synchronous>, transform_indices = @transform_1, window_bounds = array<i64: 96, 128>}, {pipeline_mode = #tpu.pipeline_mode<synchronous>, transform_indices = @transform_2, window_bounds = array<i64: 1, 128>}, {transform_indices = @transform_3, window_bounds = array<i64: 16, 128>}]} {
    %c0 = arith.constant 0 : index
    %c0_0 = arith.constant 0 : index
    %0 = vector.load %arg1[%c0, %c0_0] : memref<16x32xf32, #tpu.memory_space<vmem>>, vector<16x32xf32>
    %1 = tpu.iota {dimensions = array<i32: 0>} : vector<16x32xi32>
    %c8_i32 = arith.constant 8 : i32
    %c0_i32 = arith.constant 0 : i32
    %2 = arith.cmpi eq, %c8_i32, %c0_i32 : i32
    %c1_i32 = arith.constant 1 : i32
    %3 = arith.select %2, %c1_i32, %c8_i32 : i32
    %4 = vector.broadcast %3 : i32 to vector<16x32xi32>
    %5 = arith.remsi %1, %4 : vector<16x32xi32>
    %c0_i32_1 = arith.constant 0 : i32
    %6 = vector.broadcast %c0_i32_1 : i32 to vector<16x32xi32>
    %7 = arith.cmpi ne, %5, %6 : vector<16x32xi32>
    %c0_i32_2 = arith.constant 0 : i32
    %8 = vector.broadcast %c0_i32_2 : i32 to vector<16x32xi32>
    %9 = arith.cmpi slt, %5, %8 : vector<16x32xi32>
    %c0_i32_3 = arith.constant 0 : i32
    %10 = arith.cmpi slt, %3, %c0_i32_3 : i32
    %11 = vector.broadcast %10 : i1 to vector<16x32xi1>
    %12 = vector.broadcast %11 : vector<16x32xi1> to vector<16x32xi1>
    %13 = arith.xori %9, %12 : vector<16x32xi1>
    %14 = arith.andi %13, %7 : vector<16x32xi1>
    %15 = vector.broadcast %3 : i32 to vector<16x32xi32>
    %16 = arith.addi %5, %15 : vector<16x32xi32>
    %17 = arith.select %14, %16, %5 : vector<16x32xi1>, vector<16x32xi32>
    %cst = arith.constant 0.000000e+00 : f32
    %18 = vector.broadcast %cst : f32 to vector<1x32xf32>
    %c0_4 = arith.constant 0 : index
    %c32 = arith.constant 32 : index
    %19 = vector.load %arg5[%c0_4, %c32] : memref<16x96xf32, #tpu.memory_space<vmem>>, vector<16x32xf32>
    tpu.vector_store %arg5[%c0_4, %c32], %0 {strides = array<i32>} : memref<16x96xf32, #tpu.memory_space<vmem>>, vector<16x32xf32>,
    %c0_5 = arith.constant 0 : index
    %c0_6 = arith.constant 0 : index
    %20 = vector.load %arg5[%c0_5, %c0_6] : memref<16x96xf32, #tpu.memory_space<vmem>>, vector<1x32xf32>
    tpu.vector_store %arg5[%c0_5, %c0_6], %18 {strides = array<i32>} : memref<16x96xf32, #tpu.memory_space<vmem>>, vector<1x32xf32>,
    %c7_i32 = arith.constant 7 : i32
    %21 = vector.broadcast %c7_i32 : i32 to vector<16x32xi32>
    %22 = arith.cmpi eq, %17, %21 : vector<16x32xi32>
    %cst_7 = arith.constant 0.000000e+00 : f32
    %23 = vector.broadcast %cst_7 : f32 to vector<16x32xf32>
    %24 = arith.select %22, %23, %0 : vector<16x32xi1>, vector<16x32xf32>
    %25 = vector.extract_strided_slice %24 {offsets = [0, 0], sizes = [15, 32], strides = [1, 1]} : vector<16x32xf32> to vector<15x32xf32>
    %c1 = arith.constant 1 : index
    %c0_8 = arith.constant 0 : index
    %26 = vector.load %arg5[%c1, %c0_8] : memref<16x96xf32, #tpu.memory_space<vmem>>, vector<15x32xf32>
    tpu.vector_store %arg5[%c1, %c0_8], %25 {strides = array<i32>} : memref<16x96xf32, #tpu.memory_space<vmem>>, vector<15x32xf32>,
    %c0_i32_9 = arith.constant 0 : i32
    %27 = vector.broadcast %c0_i32_9 : i32 to vector<16x32xi32>
    %28 = arith.cmpi eq, %17, %27 : vector<16x32xi32>
    %cst_10 = arith.constant 0.000000e+00 : f32
    %29 = vector.broadcast %cst_10 : f32 to vector<16x32xf32>
    %30 = arith.select %28, %29, %0 : vector<16x32xi1>, vector<16x32xf32>
    %31 = vector.extract_strided_slice %30 {offsets = [1, 0], sizes = [15, 32], strides = [1, 1]} : vector<16x32xf32> to vector<15x32xf32>
    %c0_11 = arith.constant 0 : index
    %c64 = arith.constant 64 : index
    %32 = vector.load %arg5[%c0_11, %c64] : memref<16x96xf32, #tpu.memory_space<vmem>>, vector<15x32xf32>
    tpu.vector_store %arg5[%c0_11, %c64], %31 {strides = array<i32>} : memref<16x96xf32, #tpu.memory_space<vmem>>, vector<15x32xf32>,
    %c15 = arith.constant 15 : index
    %c64_12 = arith.constant 64 : index
    %33 = vector.load %arg5[%c15, %c64_12] : memref<16x96xf32, #tpu.memory_space<vmem>>, vector<1x32xf32>
    tpu.vector_store %arg5[%c15, %c64_12], %18 {strides = array<i32>} : memref<16x96xf32, #tpu.memory_space<vmem>>, vector<1x32xf32>,
    %c0_13 = arith.constant 0 : index
    %c0_14 = arith.constant 0 : index
    %34 = vector.load %arg5[%c0_13, %c0_14] : memref<16x96xf32, #tpu.memory_space<vmem>>, vector<16x96xf32>
    %c0_15 = arith.constant 0 : index
    %c0_16 = arith.constant 0 : index
    %35 = vector.load %arg2[%c0_15, %c0_16] : memref<96x128xf32, #tpu.memory_space<vmem>>, vector<96x128xf32>
    %cst_17 = arith.constant dense<0.000000e+00> : vector<16x128xf32>
    %36 = tpu.matmul %34, %35, %cst_17 {dimension_numbers = #tpu.dot_dimension_numbers<[1], [0], [0], [1], [0, 0, 1, 1], [], []>} : vector<16x96xf32>, vector<96x128xf32>, vector<16x128xf32> -> vector<16x128xf32>
    %c0_18 = arith.constant 0 : index
    %c0_19 = arith.constant 0 : index
    %37 = vector.load %arg3[%c0_18, %c0_19] : memref<1x128xf32, #tpu.memory_space<vmem>>, vector<1x128xf32>
    %38 = vector.broadcast %37 : vector<1x128xf32> to vector<16x128xf32>
    %39 = arith.addf %36, %38 : vector<16x128xf32>
    %cst_20 = arith.constant 0.000000e+00 : f32
    %40 = vector.broadcast %cst_20 : f32 to vector<16x128xf32>
    %41 = arith.maximumf %39, %40 : vector<16x128xf32>
    %c0_21 = arith.constant 0 : index
    %c0_22 = arith.constant 0 : index
    %42 = vector.load %arg4[%c0_21, %c0_22] : memref<16x128xf32, #tpu.memory_space<vmem>>, vector<16x128xf32>
    tpu.vector_store %arg4[%c0_21, %c0_22], %41 {strides = array<i32>} : memref<16x128xf32, #tpu.memory_space<vmem>>, vector<16x128xf32>,
    return
  }
  func.func @transform_0(%arg0: i32) -> (i32, i32) {
    %c0_i32 = arith.constant 0 : i32
    %c0_i32_0 = arith.constant 0 : i32
    return %arg0, %c0_i32 : i32, i32
  }
  func.func @transform_1(%arg0: i32) -> (i32, i32) {
    %c0_i32 = arith.constant 0 : i32
    %c0_i32_0 = arith.constant 0 : i32
    %c0_i32_1 = arith.constant 0 : i32
    return %c0_i32, %c0_i32_0 : i32, i32
  }
  func.func @transform_2(%arg0: i32) -> (i32, i32) {
    %c0_i32 = arith.constant 0 : i32
    %c0_i32_0 = arith.constant 0 : i32
    %c0_i32_1 = arith.constant 0 : i32
    return %c0_i32, %c0_i32_0 : i32, i32
  }
  func.func @transform_3(%arg0: i32) -> (i32, i32) {
    %c0_i32 = arith.constant 0 : i32
    %c0_i32_0 = arith.constant 0 : i32
    return %arg0, %c0_i32 : i32, i32
  }
}

</mosaic_0001>

<bundles_post_ra>
// kernel: tpu_custom_call.1
= control target key start
LH: loop header
LB: loop body
LE: loop exit
PB: predicated region body
PF: predicated region fallthrough
CT: control target
= control target key end

     0   :  { %8 = vsyncpa [#allocation4], 0  ;;  %s425_s0 = inlined_call_operand.hbm [shape: f32[16,32], index: 0, kind: input, shape index: {}]   ;;  %s426_s1 = inlined_call_operand.hbm [shape: f32[96,128], index: 1, kind: input, shape index: {}]   ;;  %s427_s2 = inlined_call_operand.vmem [shape: f32[1,128], index: 2, kind: input, shape index: {}]   ;;  %s428_s3 = inlined_call_operand.hbm [shape: f32[16,128], index: 3, kind: output, shape index: {}]  }
   0x1   :  { %9 = vsyncpa [#allocation7], 0 }
   0x2   :  { %10 = vsyncpa [#allocation5], 0  ;;  %s354_s12 = smov [#allocation3]  }
   0x3   :  { %s16_s13 = sshll.u32 %s354_s12, 4  ;;  %s17_s13 = int_to_ptr.vmem [resolvable:$true] %s16_s13 }
   0x4   :  { %s296_s14 = scalar_lea.vmem %s17_s13, 256  ;;  %p301_p1 = scmp.lt.s32.totalorder %s17_s13, %s17_s13 }
   0x5   :  { %p297_p0 = scmp.ne.s32.totalorder %s17_s13, %s296_s14  ;;  %p302_p2 = scmp.lt.s32.totalorder %s296_s14, %s296_s14 }
   0x7   :  { %p303_p3 = por %p302_p2, %p301_p1 }
   0x9   :  { %p304_p4 = pnand %p303_p3, %p297_p0 }
   0xb   :  { %307 = shalt.err (!%p304_p4)
}
   0xc   :  { %s355_s15 = smov 128   ;;  %s356_s16 = smov 8  }
   0xd   :  { %22 = dma.hbm_to_vmem [thread:$0]  %s425_s0, 256, %s17_s13, [#allocation4], %s355_s15, %s355_s15, %s356_s16  }
   0xe   :  { %s357_s19 = smov [#allocation6]  }
   0xf   :  { %s28_s20 = sshll.u32 %s357_s19, 4  ;;  %s29_s20 = int_to_ptr.vmem [resolvable:$true] %s28_s20 }
  0x10   :  { %s316_s21 = scalar_lea.vmem %s29_s20, 1536  ;;  %p321_p6 = scmp.lt.s32.totalorder %s29_s20, %s29_s20 }
  0x11   :  { %p317_p5 = scmp.ne.s32.totalorder %s29_s20, %s316_s21  ;;  %p322_p7 = scmp.lt.s32.totalorder %s316_s21, %s316_s21 }
  0x13   :  { %p323_p8 = por %p322_p7, %p321_p6 }
  0x15   :  { %p324_p9 = pnand %p323_p8, %p317_p5 }
  0x17   :  { %327 = shalt.err (!%p324_p9)
}
  0x18   :  { %34 = dma.hbm_to_vmem [thread:$0]  %s426_s1, 1536, %s29_s20, [#allocation7], %s355_s15, %s355_s15, %s356_s16  }
  0x19   :  { %348 = dma.done.wait [#allocation4], 256  }
  0x1a   :  { %349 = vsyncadd [#allocation4], 4294967040 }
  0x1b   :  { %350 = dma.done.wait [#allocation7], 1536  }
  0x1c   :  { %351 = vsyncadd [#allocation7], 4294965760  ;;  %v45_v0 = vlaneseq  ;;  %v398_v6 = vld [vmem:[#allocation3] sm:$0xff]  ;;  %v400_v7 = vld [vmem:[#allocation3 + $0x8] sm:$0xff]  ;;  %s358_s0 = smov 32   ;;  %s359_s1 = smov 64  }
  0x1d   :  { %v124_v8 = vld [vmem:[#allocation6 + $0x58] sm:$0xff]  ;;  %74 = vrot.lane.b32.xlu0 %v398_v6, %s358_s0  ;;  %v123_v12 = vld [vmem:[#allocation6 + $0x50] sm:$0xff]  ;;  %v122_v14 = vld [vmem:[#allocation6 + $0x48] sm:$0xff]  ;;  %vm80_vm4 = vcmask 523520   ;;  %vm83_vm5 = vcmask 253952   ;;  %v360_v27 = vmov 0.0  }
  0x1e   :  { %v46_v1 = vshrl.u32 %v45_v0, 7  ;;  %253 = vmatprep.subr.mxu0 %v124_v8  ;;  %v121_v16 = vld [vmem:[#allocation6 + $0x40] sm:$0xff]  ;;  %v120_v17 = vld [vmem:[#allocation6 + $0x38] sm:$0xff]  ;;  %v119_v18 = vld [vmem:[#allocation6 + $0x30] sm:$0xff]  ;;  %vm89_vm6 = vcmask 261120   ;;  %vm91_vm7 = vcmask 260096  }
  0x1f   :  { %254 = vmatpush3.msra.mxu0 %v124_v8  ;;  %v118_v19 = vld [vmem:[#allocation6 + $0x28] sm:$0xff]  ;;  %v117_v20 = vld [vmem:[#allocation6 + $0x20] sm:$0xff]  ;;  %v116_v21 = vld [vmem:[#allocation6 + $0x18] sm:$0xff]  ;;  %vm105_vm8 = vcmask 785921   ;;  %vm109_vm9 = vcmask 778752   ;;  %vm107_vm10 = vcmask 785920  }
  0x20   :  { %v52_v2 = vand.u32 7, %v46_v1  ;;  %v47_v3 = vadd.s32 8, %v46_v1  ;;  %255 = vmatprep.subr.mxu0 %v123_v12  ;;  %v115_v22 = vld [vmem:[#allocation6 + $0x10] sm:$0xff]  ;;  %v114_v23 = vld [vmem:[#allocation6 + $0x8] sm:$0xff]  ;;  %v113_v24 = vld [vmem:[#allocation6] sm:$0xff]  ;;  %vm132_vm11 = vcmask 785408  }
  0x21   :  { %256 = vmatpush3.msra.mxu0 %v123_v12  ;;  %76 = vrot.lane.b32.xlu0 %v400_v7, %s358_s0  ;;  %v236_v32 = vld [vmem:[%s427_s2] ss:$0 sm:$0xff]  ;;  %s361_s26 = smov [#allocation8]  }
  0x22   :  { %vm394_vm0 = vcmp.eq.s32.totalorder %v52_v2, 7  ;;  %vm93_vm1 = vcmp.eq.s32.totalorder %v52_v2, 0  ;;  %v59_v5 = vand.u32 7, %v47_v3  ;;  %257 = vmatprep.subr.mxu0 %v122_v14  ;;  %s223_s27 = sshll.u32 %s361_s26, 4  ;;  %s224_s27 = int_to_ptr.vmem [resolvable:$true] %s223_s27 }
  0x23   :  { %v95_v9 = vsel %vm93_vm1, 0.0, %v398_v6  ;;  %v87_v10 = vsel %vm394_vm0, 0.0, %v398_v6  ;;  %258 = vmatpush3.msra.mxu0 %v122_v14  ;;  %s328_s28 = scalar_lea.vmem %s224_s27, 256  ;;  %p333_p11 = scmp.lt.s32.totalorder %s224_s27, %s224_s27 }
  0x24   :  { %vm407_vm2 = vcmp.eq.s32.totalorder %v59_v5, 7  ;;  %vm94_vm3 = vcmp.eq.s32.totalorder %v59_v5, 0  ;;  %99 = vrot.lane.b32.xlu1 %v95_v9, %s359_s1  ;;  %259 = vmatprep.subr.mxu0 %v121_v16  ;;  %p329_p10 = scmp.ne.s32.totalorder %s224_s27, %s328_s28  ;;  %p334_p12 = scmp.lt.s32.totalorder %s328_s28, %s328_s28 }
  0x25   :  { %v88_v13 = vsel %vm407_vm2, 0.0, %v400_v7  ;;  %v96_v15 = vsel %vm94_vm3, 0.0, %v400_v7  ;;  %260 = vmatpush3.msra.mxu0 %v121_v16 }
  0x26   :  { %261 = vmatprep.subr.mxu0 %v120_v17  ;;  %p335_p13 = por %p334_p12, %p333_p11 }
  0x27   :  { %262 = vmatpush3.msra.mxu0 %v120_v17 }
  0x28   :  { %101 = vrot.lane.b32.xlu1 %v96_v15, %s359_s1  ;;  %263 = vmatprep.subr.mxu0 %v119_v18  ;;  %p336_p0 = pnand %p335_p13, %p329_p10 }
  0x29   :  { %264 = vmatpush3.msra.mxu0 %v119_v18 }
  0x2a   :  { %265 = vmatprep.subr.mxu0 %v118_v19 }
  0x2b   :  { %266 = vmatpush3.msra.mxu0 %v118_v19 }
  0x2c   :  { %267 = vmatprep.subr.mxu0 %v117_v20 }
  0x2d   :  { %268 = vmatpush3.msra.mxu0 %v117_v20 }
  0x2e   :  { %269 = vmatprep.subr.mxu0 %v116_v21 }
  0x2f   :  { %270 = vmatpush3.msra.mxu0 %v116_v21 }
  0x30   :  { %271 = vmatprep.subr.mxu0 %v115_v22 }
  0x31   :  { %272 = vmatpush3.msra.mxu0 %v115_v22 }
  0x32   :  { %273 = vmatprep.subr.mxu0 %v114_v23 }
  0x33   :  { %274 = vmatpush3.msra.mxu0 %v114_v23 }
  0x34   :  { %275 = vmatprep.subr.mxu0 %v113_v24 }
  0x35   :  { %276 = vmatpush3.msra.mxu0 %v113_v24 }
  0x8f   :  { %v75_v25 = vpop.permute.xlu0 %74 }
  0x90   :  { %81 = vst.msk [vmem:[#allocation2] sm:$0xff] %vm80_vm4, %v75_v25 }
  0x91   :  { %84 = vst.msk [vmem:[#allocation2] sm:$0x1] %vm83_vm5, %v360_v27 }
  0x93   :  { %v77_v28 = vpop.permute.xlu0 %76 }
  0x94   :  { %82 = vst.msk [vmem:[#allocation2 + $0x8] sm:$0xff] %vm80_vm4, %v77_v28 }
  0x95   :  { %90 = vst.msk [vmem:[#allocation2 + $0x1] sm:$0xff] %vm89_vm6, %v87_v10 }
  0x96   :  { %v100_v26 = vpop.permute.xlu1 %99  ;;  %92 = vst.msk [vmem:[#allocation2 + $0x9] sm:$0x7f] %vm91_vm7, %v88_v13 }
  0x97   :  { %106 = vst.msk [vmem:[#allocation2 - $0x1] sm:$0xfe] %vm105_vm8, %v100_v26 }
  0x98   :  { %110 = vst.msk [vmem:[#allocation2 + $0xf] sm:$0x1] %vm109_vm9, %v360_v27 }
  0x9a   :  { %v102_v29 = vpop.permute.xlu1 %101 }
  0x9b   :  { %108 = vst.msk [vmem:[#allocation2 + $0x7] sm:$0xff] %vm107_vm10, %v102_v29 }
  0xa2   :  { %v111_v30 = vld [vmem:[#allocation2] sm:$0xff]  ;;  %v112_v31 = vld [vmem:[#allocation2 + $0x8] sm:$0xff] }
  0xa3   :  { %277 = vmatprep.mubr.msk.f32.mxu0 %vm132_vm11, %v111_v30 }
  0xa4   :  { %278 = vmatmul.mubr.msk.f32.vlgmr.msra.gmra.mxu0 %vm132_vm11, %v112_v31 }
 0x164   :  { %v279_v33 = vpop.f32.mrf.mxu0 }
 0x165   :  { %v211_v34 = vadd.f32 %v279_v33, %v236_v32 }
 0x166   :  { %v205_v35 = vpop.f32.mrf.mxu0 }
 0x167   :  { %v215_v36 = vmax.f32 %v211_v34, 0.0  ;;  %v206_v37 = vadd.f32 %v236_v32, %v205_v35 }
 0x169   :  { %217 = vst [vmem:[#allocation8 + $0x8] sm:$0xff] %v215_v36  ;;  %v214_v38 = vmax.f32 %v206_v37, 0.0 }
 0x16b   :  { %216 = vst [vmem:[#allocation8] sm:$0xff] %v214_v38 }
 0x16c   :  { %339 = shalt.err (!%p336_p0)
}
 0x16d   :  { %229 = dma.vmem_to_hbm [thread:$0]  %s224_s27, 256, %s428_s3, [#allocation5], %s355_s15, %s355_s15, %s356_s16  }
 0x16e   :  { %352 = dma.done.wait [#allocation5], 256  }
 0x16f   :  { %353 = vsyncadd [#allocation5], 4294967040 }
 0x170   :  { %233 = vsyncpa [#allocation4], 1 }
 0x171   :  { %234 = vsyncpa [#allocation7], 1 }
 0x172   :  { %235 = vsyncpa [#allocation5], 1 }

</bundles_post_ra>
